<compile_context>
chip_gen: v7x
topology: tpu7x:2x2x1
jax: 0.10.0
libtpu: 0.0.40
codegen_flags: <defaults>
</compile_context>

<pallas_src>
import functools

import jax
import jax.numpy as jnp
from jax.experimental import pallas as pl
from jax.experimental.pallas import tpu as pltpu

LANE = 128      # lane width (last dim)
SUBLANE = 8     # sublane width (second-to-last dim)


def _round_up(x, m):
    return (x + m - 1) // m * m


def _replicated_spec(shape):
    """Full-array block that is identical for every grid step (weights)."""
    nd = len(shape)
    return pl.BlockSpec(shape, lambda b, t: (0,) * nd)


def _make_tcn_kernel(layer_cfg, tile_l, n_weights):
    """Fused multi-layer TCN kernel for one (batch, L-tile) grid step.

    Refs (positional): x_ref, *weight_refs, o_ref, *history_scratch_refs.
      x_ref   : (1, TL, C0_pad)     input tile (compute dtype)
      weights : per layer [w1 (K*Cin_p, Cout_p), b1 (1, Cout_p) f32,
                           w2 (K*Cout_p, Cout_p), b2 (1, Cout_p) f32,
                           (wd (Cin_p, Cout_p), bd (1, Cout_p) f32)?]
      o_ref   : (1, TL, Clast_pad)
      scratch : per layer with P > 0: hist_in (P_al, Cin_p), hist_h1 (P_al, Cout_p)
    """
    n_layers = len(layer_cfg)

    def kernel(x_ref, *rest):
        w_refs = rest[:n_weights]
        o_ref = rest[n_weights]
        scratch = rest[n_weights + 1:]

        t = pl.program_id(1)
        cdt = x_ref.dtype            # matmul operand dtype (f32 or bf16)

        # A new sequence starts at t == 0: clear all carried causal history
        # (this emulates the implicit zero left-padding of the causal conv).
        if scratch:
            @pl.when(t == 0)
            def _():
                for h in scratch:
                    h[...] = jnp.zeros(h.shape, h.dtype)

        def causal_taps(src, hist_ref, K, d, P, P_al):
            """Merged-tap operand (TL, K*C) for a causal dilated conv.

            hist_ref holds the last P_al (>= P, multiple of 8) rows of the
            stream feeding this conv; it is updated for the next L-tile.
            """
            if P == 0:                       # kernel_size == 1: no history
                return src
            work = jnp.concatenate([hist_ref[...], src], axis=0)  # (P_al+TL, C)
            # Carry the last P_al stream rows for the next tile.  Both the
            # offset (TL) and the length (P_al) are multiples of 8, so the
            # store is sublane-aligned.
            if tile_l >= P_al:
                hist_ref[...] = src[tile_l - P_al:, :]
            else:
                hist_ref[...] = work[tile_l:, :]
            taps = []
            for k in range(K):
                shift = (K - 1 - k) * d
                if shift == 0:
                    taps.append(src)          # current tap: no copy needed
                else:
                    taps.append(work[P_al - shift:P_al - shift + tile_l, :])
            return jnp.concatenate(taps, axis=1)                   # (TL, K*C)

        cur = x_ref[0]               # (TL, C_in_pad), compute dtype
        wi = 0                       # weight-ref cursor
        si = 0                       # scratch cursor
        for li, cfg in enumerate(layer_cfg):
            K, d = cfg["kernel_size"], cfg["dilation"]
            P, P_al = cfg["pad"], cfg["pad_al"]

            w1, b1 = w_refs[wi], w_refs[wi + 1]
            w2, b2 = w_refs[wi + 2], w_refs[wi + 3]
            wi += 4
            if P > 0:
                hist_in, hist_h1 = scratch[si], scratch[si + 1]
                si += 2
            else:
                hist_in = hist_h1 = None

            # ---- conv1 (causal dilated) as a single merged-tap MXU matmul ----
            taps1 = causal_taps(cur, hist_in, K, d, P, P_al)
            h1 = jnp.maximum(
                jnp.dot(taps1, w1[...], preferred_element_type=jnp.float32)
                + b1[...], 0.0)
            # dropout1: identity (eval mode)

            # ---- conv2 ----
            taps2 = causal_taps(h1.astype(cdt), hist_h1, K, d, P, P_al)
            h2 = jnp.maximum(
                jnp.dot(taps2, w2[...], preferred_element_type=jnp.float32)
                + b2[...], 0.0)
            # dropout2: identity (eval mode)

            # ---- residual: 1x1 conv only when channel counts differ ----
            if cfg["has_downsample"]:
                wd, bd = w_refs[wi], w_refs[wi + 1]
                wi += 2
                res = (jnp.dot(cur, wd[...], preferred_element_type=jnp.float32)
                       + bd[...])
            else:
                res = cur.astype(jnp.float32)   # identity residual, no matmul

            blk = jnp.maximum(h2 + res, 0.0)
            if li == n_layers - 1:
                o_ref[0] = blk.astype(o_ref.dtype)   # lane-dense writeback
            else:
                cur = blk.astype(cdt)

    return kernel


def temporal_conv_net(x_ncl, params, *, tile_l=None,
                      compute_dtype=jnp.float32, vmem_limit_bytes=None):
    """Full TCN forward.  x_ncl: (B, C_in, L) -> (B, C_last, L), NCL like torch.

    params: list of (w1 (K,Cin,Cout), b1 (1,Cout), w2 (K,Cout,Cout), b2 (1,Cout),
                     wd (Cin,Cout) or None, bd (1,Cout) or None) per block.
    tile_l: L-tile size (rounded up to a multiple of 8).  For long sequences
            pick 256-1024 such that the per-step working set fits the scoped
            VMEM budget of the target generation (v7x has only 64 MiB total).
    compute_dtype: MXU operand dtype (jnp.bfloat16 recommended on v6e/v7x);
            accumulation is always f32.
    """
    B, C0, L = x_ncl.shape
    out_dtype = x_ncl.dtype
    x = jnp.transpose(x_ncl, (0, 2, 1))            # -> (B, L, C0)

    if tile_l is None:
        tile_l = min(512, _round_up(L, SUBLANE))
    TL = max(SUBLANE, _round_up(tile_l, SUBLANE))
    L_pad = _round_up(L, TL)
    NT = L_pad // TL

    c0_p = _round_up(C0, LANE)
    # Single pad of the input: trailing length pad + lane-dense channel pad,
    # cast once to the MXU operand dtype (halves HBM traffic for bf16).
    x_p = jnp.pad(x, ((0, 0), (0, L_pad - L), (0, c0_p - C0))).astype(compute_dtype)

    flat_w, layer_cfg, scratch_shapes = [], [], []
    flops = 0

    c_in, cin_p = C0, c0_p
    for i, (w1, b1, w2, b2, wd, bd) in enumerate(params):
        K, _, c_out = w1.shape
        cout_p = _round_up(c_out, LANE)
        d = 2 ** i
        P = (K - 1) * d
        P_al = _round_up(P, SUBLANE) if P > 0 else 0

        # Zero-pad channels to 128 multiples, flatten taps -> (K*Cin_p, Cout_p),
        # convert weights to the MXU dtype once outside the kernel.
        w1p = jnp.zeros((K, cin_p, cout_p), compute_dtype)
        w1p = w1p.at[:, :c_in, :c_out].set(w1.astype(compute_dtype))
        w2p = jnp.zeros((K, cout_p, cout_p), compute_dtype)
        w2p = w2p.at[:, :c_out, :c_out].set(w2.astype(compute_dtype))
        b1p = jnp.zeros((1, cout_p), jnp.float32).at[:, :c_out].set(
            b1.astype(jnp.float32))
        b2p = jnp.zeros((1, cout_p), jnp.float32).at[:, :c_out].set(
            b2.astype(jnp.float32))
        flat_w += [w1p.reshape(K * cin_p, cout_p), b1p,
                   w2p.reshape(K * cout_p, cout_p), b2p]
        flops += 2 * B * L_pad * (K * cin_p * cout_p + K * cout_p * cout_p)

        has_ds = wd is not None
        if has_ds:
            wdp = jnp.zeros((cin_p, cout_p), compute_dtype)
            wdp = wdp.at[:c_in, :c_out].set(wd.astype(compute_dtype))
            bdp = jnp.zeros((1, cout_p), jnp.float32).at[:, :c_out].set(
                bd.astype(jnp.float32))
            flat_w += [wdp, bdp]
            flops += 2 * B * L_pad * cin_p * cout_p

        if P_al > 0:
            scratch_shapes.append(pltpu.VMEM((P_al, cin_p), compute_dtype))
            scratch_shapes.append(pltpu.VMEM((P_al, cout_p), compute_dtype))

        layer_cfg.append(dict(kernel_size=K, dilation=d, pad=P, pad_al=P_al,
                              has_downsample=has_ds))
        c_in, cin_p = c_out, cout_p

    c_last, clast_p = c_in, cin_p

    x_spec = pl.BlockSpec((1, TL, c0_p), lambda b, t: (b, t, 0))
    w_specs = [_replicated_spec(w.shape) for w in flat_w]
    o_spec = pl.BlockSpec((1, TL, clast_p), lambda b, t: (b, t, 0))

    kernel = _make_tcn_kernel(layer_cfg, TL, len(flat_w))

    cp_kwargs = dict(dimension_semantics=("parallel", "arbitrary"))
    if vmem_limit_bytes is not None:
        cp_kwargs["vmem_limit_bytes"] = vmem_limit_bytes

    bytes_accessed = int(x_p.size * x_p.dtype.itemsize
                         + B * L_pad * clast_p * jnp.dtype(out_dtype).itemsize
                         + sum(int(w.size * w.dtype.itemsize) for w in flat_w))

    out = pl.pallas_call(
        kernel,
        out_shape=jax.ShapeDtypeStruct((B, L_pad, clast_p), out_dtype),
        grid_spec=pltpu.PrefetchScalarGridSpec(
            num_scalar_prefetch=0,
            grid=(B, NT),
            in_specs=[x_spec] + w_specs,
            out_specs=o_spec,
            scratch_shapes=scratch_shapes,
        ),
        compiler_params=pltpu.CompilerParams(**cp_kwargs),
        cost_estimate=pl.CostEstimate(flops=int(flops), transcendentals=0,
                                      bytes_accessed=bytes_accessed),
    )(x_p, *flat_w)

    out = out[:, :L, :c_last]
    return jnp.transpose(out, (0, 2, 1))           # -> (B, C_last, L)


def init_tcn_params(key, num_inputs, num_channels, kernel_size=2,
                    dtype=jnp.float32):
    """Deterministic synthetic parameters mirroring the PyTorch __init__.

    Conv weights ~ N(0, 0.01) like init_weights(); stored tap-major
    (K, C_in, C_out) = torch weight (C_out, C_in, K) transposed.  wd/bd are
    None when n_inputs == n_outputs (no downsample in the PyTorch module).
    """
    params = []
    c_in = num_inputs
    for c_out in num_channels:
        key, k1, k2, k3, k4, k5, k6 = jax.random.split(key, 7)
        w1 = 0.01 * jax.random.normal(k1, (kernel_size, c_in, c_out), dtype)
        b1 = 0.05 * jax.random.normal(k2, (1, c_out), dtype)
        w2 = 0.01 * jax.random.normal(k3, (kernel_size, c_out, c_out), dtype)
        b2 = 0.05 * jax.random.normal(k4, (1, c_out), dtype)
        if c_in != c_out:
            wd = 0.01 * jax.random.normal(k5, (c_in, c_out), dtype)
            bd = 0.05 * jax.random.normal(k6, (1, c_out), dtype)
        else:
            wd, bd = None, None
        params.append((w1, b1, w2, b2, wd, bd))
        c_in = c_out
    return params


# ------------------------- plain-JAX f32 reference -------------------------
def _block_ref(x_nlc, params, dilation):
    w1, b1, w2, b2, wd, bd = params
    B, L, _ = x_nlc.shape
    K = w1.shape[0]
    P = (K - 1) * dilation

    def causal_conv(h, w, b):
        hp = jnp.pad(h, ((0, 0), (P, 0), (0, 0)))
        acc = jnp.broadcast_to(b[None].astype(jnp.float32), (B, L, w.shape[2]))
        for k in range(K):
            acc = acc + jnp.einsum(
                'blc,ch->blh', hp[:, k * dilation:k * dilation + L, :], w[k])
        return acc

    h1 = jnp.maximum(causal_conv(x_nlc, w1, b1), 0.0)
    h2 = jnp.maximum(causal_conv(h1, w2, b2), 0.0)
    if wd is not None:
        res = jnp.einsum('blc,ch->blh', x_nlc, wd) + bd[None]
    else:
        res = x_nlc
    return jnp.maximum(h2 + res, 0.0)


def tcn_ref(x_ncl, params):
    x = jnp.transpose(x_ncl, (0, 2, 1))
    for i, p in enumerate(params):
        x = _block_ref(x, p, dilation=2 ** i)
    return jnp.transpose(x, (0, 2, 1))


if __name__ == "__main__":
    B, C_IN, L = 2, 4, 16
    NUM_CHANNELS = [32, 32]       # two TemporalBlocks, dilations 1 and 2
    KERNEL_SIZE = 2
    TILE_L = 8                    # two L-tiles -> exercises the history carry

    key = jax.random.PRNGKey(0)
    kx, kp = jax.random.split(key)
    x = jax.random.normal(kx, (B, C_IN, L), jnp.float32)      # NCL, like torch
    params = init_tcn_params(kp, C_IN, NUM_CHANNELS, KERNEL_SIZE)

    ref = tcn_ref(x, params)

    # f32 run: matches the PyTorch forward semantics.
    fwd = jax.jit(functools.partial(temporal_conv_net, tile_l=TILE_L,
                                    compute_dtype=jnp.float32))
    out = jax.block_until_ready(fwd(x, params))
    assert out.shape == (B, NUM_CHANNELS[-1], L), out.shape
    assert jnp.allclose(out, ref, atol=2e-4, rtol=2e-4), \
        float(jnp.max(jnp.abs(out - ref)))

    # bf16-operand run (v6e/v7x MXU fast path, f32 accumulation inside).
    fwd_bf16 = jax.jit(functools.partial(temporal_conv_net, tile_l=TILE_L,
                                         compute_dtype=jnp.bfloat16))
    out_bf16 = jax.block_until_ready(fwd_bf16(x, params))
    assert out_bf16.shape == (B, NUM_CHANNELS[-1], L), out_bf16.shape
    assert jnp.allclose(out_bf16, ref, atol=5e-2, rtol=5e-2), \
        float(jnp.max(jnp.abs(out_bf16 - ref)))

    # TODO(synk): dropout is modeled as identity (eval mode); training-mode
    # dropout would need pltpu.prng_* masks inside the kernel.
    print("KERNEL_OK")
</pallas_src>

<mosaic_0001>
module attributes {stable_mosaic.version = 11 : i64} {
  func.func @kernel(%arg0: i32, %arg1: i32, %arg2: memref<1x8x128xf32, #tpu.memory_space<vmem>>, %arg3: memref<256x128xf32, #tpu.memory_space<vmem>>, %arg4: memref<1x128xf32, #tpu.memory_space<vmem>>, %arg5: memref<256x128xf32, #tpu.memory_space<vmem>>, %arg6: memref<1x128xf32, #tpu.memory_space<vmem>>, %arg7: memref<128x128xf32, #tpu.memory_space<vmem>>, %arg8: memref<1x128xf32, #tpu.memory_space<vmem>>, %arg9: memref<256x128xf32, #tpu.memory_space<vmem>>, %arg10: memref<1x128xf32, #tpu.memory_space<vmem>>, %arg11: memref<256x128xf32, #tpu.memory_space<vmem>>, %arg12: memref<1x128xf32, #tpu.memory_space<vmem>>, %arg13: memref<1x8x128xf32, #tpu.memory_space<vmem>>, %arg14: memref<8x128xf32, #tpu.memory_space<vmem>>, %arg15: memref<8x128xf32, #tpu.memory_space<vmem>>, %arg16: memref<8x128xf32, #tpu.memory_space<vmem>>, %arg17: memref<8x128xf32, #tpu.memory_space<vmem>>) attributes {dimension_semantics = [#tpu.dimension_semantics<parallel>, #tpu.dimension_semantics<arbitrary>], iteration_bounds = array<i64: 2, 2>, scalar_prefetch = 0 : i64, scratch_operands = 4 : i64, tpu.core_type = #tpu.core_type<tc>, window_params = [{transform_indices = @transform_0, window_bounds = array<i64: 1, 8, 128>}, {pipeline_mode = #tpu.pipeline_mode<synchronous>, transform_indices = @transform_1, window_bounds = array<i64: 256, 128>}, {pipeline_mode = #tpu.pipeline_mode<synchronous>, transform_indices = @transform_2, window_bounds = array<i64: 1, 128>}, {pipeline_mode = #tpu.pipeline_mode<synchronous>, transform_indices = @transform_3, window_bounds = array<i64: 256, 128>}, {pipeline_mode = #tpu.pipeline_mode<synchronous>, transform_indices = @transform_4, window_bounds = array<i64: 1, 128>}, {pipeline_mode = #tpu.pipeline_mode<synchronous>, transform_indices = @transform_5, window_bounds = array<i64: 128, 128>}, {pipeline_mode = #tpu.pipeline_mode<synchronous>, transform_indices = @transform_6, window_bounds = array<i64: 1, 128>}, {pipeline_mode = #tpu.pipeline_mode<synchronous>, transform_indices = @transform_7, window_bounds = array<i64: 256, 128>}, {pipeline_mode = #tpu.pipeline_mode<synchronous>, transform_indices = @transform_8, window_bounds = array<i64: 1, 128>}, {pipeline_mode = #tpu.pipeline_mode<synchronous>, transform_indices = @transform_9, window_bounds = array<i64: 256, 128>}, {pipeline_mode = #tpu.pipeline_mode<synchronous>, transform_indices = @transform_10, window_bounds = array<i64: 1, 128>}, {transform_indices = @transform_11, window_bounds = array<i64: 1, 8, 128>}]} {
    %c0_i32 = arith.constant 0 : i32
    %0 = arith.cmpi eq, %arg1, %c0_i32 : i32
    %1 = arith.extui %0 : i1 to i32
    %c0_i32_0 = arith.constant 0 : i32
    %2 = arith.cmpi ne, %1, %c0_i32_0 : i32
    scf.if %2 {
      %cst_52 = arith.constant 0.000000e+00 : f32
      %67 = vector.broadcast %cst_52 : f32 to vector<8x128xf32>
      %c0_53 = arith.constant 0 : index
      %c0_54 = arith.constant 0 : index
      %68 = vector.load %arg14[%c0_53, %c0_54] : memref<8x128xf32, #tpu.memory_space<vmem>>, vector<8x128xf32>
      tpu.vector_store %arg14[%c0_53, %c0_54], %67 {strides = array<i32>} : memref<8x128xf32, #tpu.memory_space<vmem>>, vector<8x128xf32>,
      %cst_55 = arith.constant 0.000000e+00 : f32
      %69 = vector.broadcast %cst_55 : f32 to vector<8x128xf32>
      %c0_56 = arith.constant 0 : index
      %c0_57 = arith.constant 0 : index
      %70 = vector.load %arg15[%c0_56, %c0_57] : memref<8x128xf32, #tpu.memory_space<vmem>>, vector<8x128xf32>
      tpu.vector_store %arg15[%c0_56, %c0_57], %69 {strides = array<i32>} : memref<8x128xf32, #tpu.memory_space<vmem>>, vector<8x128xf32>,
      %cst_58 = arith.constant 0.000000e+00 : f32
      %71 = vector.broadcast %cst_58 : f32 to vector<8x128xf32>
      %c0_59 = arith.constant 0 : index
      %c0_60 = arith.constant 0 : index
      %72 = vector.load %arg16[%c0_59, %c0_60] : memref<8x128xf32, #tpu.memory_space<vmem>>, vector<8x128xf32>
      tpu.vector_store %arg16[%c0_59, %c0_60], %71 {strides = array<i32>} : memref<8x128xf32, #tpu.memory_space<vmem>>, vector<8x128xf32>,
      %cst_61 = arith.constant 0.000000e+00 : f32
      %73 = vector.broadcast %cst_61 : f32 to vector<8x128xf32>
      %c0_62 = arith.constant 0 : index
      %c0_63 = arith.constant 0 : index
      %74 = vector.load %arg17[%c0_62, %c0_63] : memref<8x128xf32, #tpu.memory_space<vmem>>, vector<8x128xf32>
      tpu.vector_store %arg17[%c0_62, %c0_63], %73 {strides = array<i32>} : memref<8x128xf32, #tpu.memory_space<vmem>>, vector<8x128xf32>,
    } else {
    }
    %c0 = arith.constant 0 : index
    %c0_1 = arith.constant 0 : index
    %c0_2 = arith.constant 0 : index
    %3 = vector.load %arg2[%c0, %c0_1, %c0_2] : memref<1x8x128xf32, #tpu.memory_space<vmem>>, vector<1x8x128xf32>
    %4 = vector.shape_cast %3 : vector<1x8x128xf32> to vector<8x128xf32>
    %c0_3 = arith.constant 0 : index
    %c0_4 = arith.constant 0 : index
    %5 = vector.load %arg14[%c0_3, %c0_4] : memref<8x128xf32, #tpu.memory_space<vmem>>, vector<8x128xf32>
    %6 = tpu.concatenate %5, %4 in 0 : vector<8x128xf32>, vector<8x128xf32> -> vector<16x128xf32>
    %c0_5 = arith.constant 0 : index
    %c0_6 = arith.constant 0 : index
    %7 = vector.load %arg14[%c0_5, %c0_6] : memref<8x128xf32, #tpu.memory_space<vmem>>, vector<8x128xf32>
    tpu.vector_store %arg14[%c0_5, %c0_6], %4 {strides = array<i32>} : memref<8x128xf32, #tpu.memory_space<vmem>>, vector<8x128xf32>,
    %8 = vector.extract_strided_slice %6 {offsets = [7, 0], sizes = [8, 128], strides = [1, 1]} : vector<16x128xf32> to vector<8x128xf32>
    %9 = tpu.concatenate %8, %4 in 1 : vector<8x128xf32>, vector<8x128xf32> -> vector<8x256xf32>
    %c0_7 = arith.constant 0 : index
    %c0_8 = arith.constant 0 : index
    %10 = vector.load %arg3[%c0_7, %c0_8] : memref<256x128xf32, #tpu.memory_space<vmem>>, vector<256x128xf32>
    %cst = arith.constant dense<0.000000e+00> : vector<8x128xf32>
    %11 = tpu.matmul %9, %10, %cst {dimension_numbers = #tpu.dot_dimension_numbers<[1], [0], [0], [1], [0, 0, 1, 1], [], []>} : vector<8x256xf32>, vector<256x128xf32>, vector<8x128xf32> -> vector<8x128xf32>
    %c0_9 = arith.constant 0 : index
    %c0_10 = arith.constant 0 : index
    %12 = vector.load %arg4[%c0_9, %c0_10] : memref<1x128xf32, #tpu.memory_space<vmem>>, vector<1x128xf32>
    %13 = vector.broadcast %12 : vector<1x128xf32> to vector<8x128xf32>
    %14 = arith.addf %11, %13 : vector<8x128xf32>
    %cst_11 = arith.constant 0.000000e+00 : f32
    %15 = vector.broadcast %cst_11 : f32 to vector<8x128xf32>
    %16 = arith.maximumf %14, %15 : vector<8x128xf32>
    %c0_12 = arith.constant 0 : index
    %c0_13 = arith.constant 0 : index
    %17 = vector.load %arg15[%c0_12, %c0_13] : memref<8x128xf32, #tpu.memory_space<vmem>>, vector<8x128xf32>
    %18 = tpu.concatenate %17, %16 in 0 : vector<8x128xf32>, vector<8x128xf32> -> vector<16x128xf32>
    %c0_14 = arith.constant 0 : index
    %c0_15 = arith.constant 0 : index
    %19 = vector.load %arg15[%c0_14, %c0_15] : memref<8x128xf32, #tpu.memory_space<vmem>>, vector<8x128xf32>
    tpu.vector_store %arg15[%c0_14, %c0_15], %16 {strides = array<i32>} : memref<8x128xf32, #tpu.memory_space<vmem>>, vector<8x128xf32>,
    %20 = vector.extract_strided_slice %18 {offsets = [7, 0], sizes = [8, 128], strides = [1, 1]} : vector<16x128xf32> to vector<8x128xf32>
    %21 = tpu.concatenate %20, %16 in 1 : vector<8x128xf32>, vector<8x128xf32> -> vector<8x256xf32>
    %c0_16 = arith.constant 0 : index
    %c0_17 = arith.constant 0 : index
    %22 = vector.load %arg5[%c0_16, %c0_17] : memref<256x128xf32, #tpu.memory_space<vmem>>, vector<256x128xf32>
    %cst_18 = arith.constant dense<0.000000e+00> : vector<8x128xf32>
    %23 = tpu.matmul %21, %22, %cst_18 {dimension_numbers = #tpu.dot_dimension_numbers<[1], [0], [0], [1], [0, 0, 1, 1], [], []>} : vector<8x256xf32>, vector<256x128xf32>, vector<8x128xf32> -> vector<8x128xf32>
    %c0_19 = arith.constant 0 : index
    %c0_20 = arith.constant 0 : index
    %24 = vector.load %arg6[%c0_19, %c0_20] : memref<1x128xf32, #tpu.memory_space<vmem>>, vector<1x128xf32>
    %25 = vector.broadcast %24 : vector<1x128xf32> to vector<8x128xf32>
    %26 = arith.addf %23, %25 : vector<8x128xf32>
    %cst_21 = arith.constant 0.000000e+00 : f32
    %27 = vector.broadcast %cst_21 : f32 to vector<8x128xf32>
    %28 = arith.maximumf %26, %27 : vector<8x128xf32>
    %c0_22 = arith.constant 0 : index
    %c0_23 = arith.constant 0 : index
    %29 = vector.load %arg7[%c0_22, %c0_23] : memref<128x128xf32, #tpu.memory_space<vmem>>, vector<128x128xf32>
    %cst_24 = arith.constant dense<0.000000e+00> : vector<8x128xf32>
    %30 = tpu.matmul %4, %29, %cst_24 {dimension_numbers = #tpu.dot_dimension_numbers<[1], [0], [0], [1], [0, 0, 1, 1], [], []>} : vector<8x128xf32>, vector<128x128xf32>, vector<8x128xf32> -> vector<8x128xf32>
    %c0_25 = arith.constant 0 : index
    %c0_26 = arith.constant 0 : index
    %31 = vector.load %arg8[%c0_25, %c0_26] : memref<1x128xf32, #tpu.memory_space<vmem>>, vector<1x128xf32>
    %32 = vector.broadcast %31 : vector<1x128xf32> to vector<8x128xf32>
    %33 = arith.addf %30, %32 : vector<8x128xf32>
    %34 = arith.addf %28, %33 : vector<8x128xf32>
    %cst_27 = arith.constant 0.000000e+00 : f32
    %35 = vector.broadcast %cst_27 : f32 to vector<8x128xf32>
    %36 = arith.maximumf %34, %35 : vector<8x128xf32>
    %c0_28 = arith.constant 0 : index
    %c0_29 = arith.constant 0 : index
    %37 = vector.load %arg16[%c0_28, %c0_29] : memref<8x128xf32, #tpu.memory_space<vmem>>, vector<8x128xf32>
    %38 = tpu.concatenate %37, %36 in 0 : vector<8x128xf32>, vector<8x128xf32> -> vector<16x128xf32>
    %c0_30 = arith.constant 0 : index
    %c0_31 = arith.constant 0 : index
    %39 = vector.load %arg16[%c0_30, %c0_31] : memref<8x128xf32, #tpu.memory_space<vmem>>, vector<8x128xf32>
    tpu.vector_store %arg16[%c0_30, %c0_31], %36 {strides = array<i32>} : memref<8x128xf32, #tpu.memory_space<vmem>>, vector<8x128xf32>,
    %40 = vector.extract_strided_slice %38 {offsets = [6, 0], sizes = [8, 128], strides = [1, 1]} : vector<16x128xf32> to vector<8x128xf32>
    %41 = tpu.concatenate %40, %36 in 1 : vector<8x128xf32>, vector<8x128xf32> -> vector<8x256xf32>
    %c0_32 = arith.constant 0 : index
    %c0_33 = arith.constant 0 : index
    %42 = vector.load %arg9[%c0_32, %c0_33] : memref<256x128xf32, #tpu.memory_space<vmem>>, vector<256x128xf32>
    %cst_34 = arith.constant dense<0.000000e+00> : vector<8x128xf32>
    %43 = tpu.matmul %41, %42, %cst_34 {dimension_numbers = #tpu.dot_dimension_numbers<[1], [0], [0], [1], [0, 0, 1, 1], [], []>} : vector<8x256xf32>, vector<256x128xf32>, vector<8x128xf32> -> vector<8x128xf32>
    %c0_35 = arith.constant 0 : index
    %c0_36 = arith.constant 0 : index
    %44 = vector.load %arg10[%c0_35, %c0_36] : memref<1x128xf32, #tpu.memory_space<vmem>>, vector<1x128xf32>
    %45 = vector.broadcast %44 : vector<1x128xf32> to vector<8x128xf32>
    %46 = arith.addf %43, %45 : vector<8x128xf32>
    %cst_37 = arith.constant 0.000000e+00 : f32
    %47 = vector.broadcast %cst_37 : f32 to vector<8x128xf32>
    %48 = arith.maximumf %46, %47 : vector<8x128xf32>
    %c0_38 = arith.constant 0 : index
    %c0_39 = arith.constant 0 : index
    %49 = vector.load %arg17[%c0_38, %c0_39] : memref<8x128xf32, #tpu.memory_space<vmem>>, vector<8x128xf32>
    %50 = tpu.concatenate %49, %48 in 0 : vector<8x128xf32>, vector<8x128xf32> -> vector<16x128xf32>
    %c0_40 = arith.constant 0 : index
    %c0_41 = arith.constant 0 : index
    %51 = vector.load %arg17[%c0_40, %c0_41] : memref<8x128xf32, #tpu.memory_space<vmem>>, vector<8x128xf32>
    tpu.vector_store %arg17[%c0_40, %c0_41], %48 {strides = array<i32>} : memref<8x128xf32, #tpu.memory_space<vmem>>, vector<8x128xf32>,
    %52 = vector.extract_strided_slice %50 {offsets = [6, 0], sizes = [8, 128], strides = [1, 1]} : vector<16x128xf32> to vector<8x128xf32>
    %53 = tpu.concatenate %52, %48 in 1 : vector<8x128xf32>, vector<8x128xf32> -> vector<8x256xf32>
    %c0_42 = arith.constant 0 : index
    %c0_43 = arith.constant 0 : index
    %54 = vector.load %arg11[%c0_42, %c0_43] : memref<256x128xf32, #tpu.memory_space<vmem>>, vector<256x128xf32>
    %cst_44 = arith.constant dense<0.000000e+00> : vector<8x128xf32>
    %55 = tpu.matmul %53, %54, %cst_44 {dimension_numbers = #tpu.dot_dimension_numbers<[1], [0], [0], [1], [0, 0, 1, 1], [], []>} : vector<8x256xf32>, vector<256x128xf32>, vector<8x128xf32> -> vector<8x128xf32>
    %c0_45 = arith.constant 0 : index
    %c0_46 = arith.constant 0 : index
    %56 = vector.load %arg12[%c0_45, %c0_46] : memref<1x128xf32, #tpu.memory_space<vmem>>, vector<1x128xf32>
    %57 = vector.broadcast %56 : vector<1x128xf32> to vector<8x128xf32>
    %58 = arith.addf %55, %57 : vector<8x128xf32>
    %cst_47 = arith.constant 0.000000e+00 : f32
    %59 = vector.broadcast %cst_47 : f32 to vector<8x128xf32>
    %60 = arith.maximumf %58, %59 : vector<8x128xf32>
    %61 = arith.addf %60, %36 : vector<8x128xf32>
    %cst_48 = arith.constant 0.000000e+00 : f32
    %62 = vector.broadcast %cst_48 : f32 to vector<8x128xf32>
    %63 = arith.maximumf %61, %62 : vector<8x128xf32>
    %c0_49 = arith.constant 0 : index
    %c0_50 = arith.constant 0 : index
    %c0_51 = arith.constant 0 : index
    %64 = vector.load %arg13[%c0_49, %c0_50, %c0_51] : memref<1x8x128xf32, #tpu.memory_space<vmem>>, vector<1x8x128xf32>
    %65 = vector.shape_cast %64 : vector<1x8x128xf32> to vector<8x128xf32>
    %66 = vector.shape_cast %63 : vector<8x128xf32> to vector<1x8x128xf32>
    tpu.vector_store %arg13[%c0_49, %c0_50, %c0_51], %66 {strides = array<i32>} : memref<1x8x128xf32, #tpu.memory_space<vmem>>, vector<1x8x128xf32>,
    return
  }
  func.func @transform_0(%arg0: i32, %arg1: i32) -> (i32, i32, i32) {
    %c0_i32 = arith.constant 0 : i32
    %c0_i32_0 = arith.constant 0 : i32
    return %arg0, %arg1, %c0_i32 : i32, i32, i32
  }
  func.func @transform_1(%arg0: i32, %arg1: i32) -> (i32, i32) {
    %c0_i32 = arith.constant 0 : i32
    %c0_i32_0 = arith.constant 0 : i32
    %c0_i32_1 = arith.constant 0 : i32
    return %c0_i32, %c0_i32_0 : i32, i32
  }
  func.func @transform_2(%arg0: i32, %arg1: i32) -> (i32, i32) {
    %c0_i32 = arith.constant 0 : i32
    %c0_i32_0 = arith.constant 0 : i32
    %c0_i32_1 = arith.constant 0 : i32
    return %c0_i32, %c0_i32_0 : i32, i32
  }
  func.func @transform_3(%arg0: i32, %arg1: i32) -> (i32, i32) {
    %c0_i32 = arith.constant 0 : i32
    %c0_i32_0 = arith.constant 0 : i32
    %c0_i32_1 = arith.constant 0 : i32
    return %c0_i32, %c0_i32_0 : i32, i32
  }
  func.func @transform_4(%arg0: i32, %arg1: i32) -> (i32, i32) {
    %c0_i32 = arith.constant 0 : i32
    %c0_i32_0 = arith.constant 0 : i32
    %c0_i32_1 = arith.constant 0 : i32
    return %c0_i32, %c0_i32_0 : i32, i32
  }
  func.func @transform_5(%arg0: i32, %arg1: i32) -> (i32, i32) {
    %c0_i32 = arith.constant 0 : i32
    %c0_i32_0 = arith.constant 0 : i32
    %c0_i32_1 = arith.constant 0 : i32
    return %c0_i32, %c0_i32_0 : i32, i32
  }
  func.func @transform_6(%arg0: i32, %arg1: i32) -> (i32, i32) {
    %c0_i32 = arith.constant 0 : i32
    %c0_i32_0 = arith.constant 0 : i32
    %c0_i32_1 = arith.constant 0 : i32
    return %c0_i32, %c0_i32_0 : i32, i32
  }
  func.func @transform_7(%arg0: i32, %arg1: i32) -> (i32, i32) {
    %c0_i32 = arith.constant 0 : i32
    %c0_i32_0 = arith.constant 0 : i32
    %c0_i32_1 = arith.constant 0 : i32
    return %c0_i32, %c0_i32_0 : i32, i32
  }
  func.func @transform_8(%arg0: i32, %arg1: i32) -> (i32, i32) {
    %c0_i32 = arith.constant 0 : i32
    %c0_i32_0 = arith.constant 0 : i32
    %c0_i32_1 = arith.constant 0 : i32
    return %c0_i32, %c0_i32_0 : i32, i32
  }
  func.func @transform_9(%arg0: i32, %arg1: i32) -> (i32, i32) {
    %c0_i32 = arith.constant 0 : i32
    %c0_i32_0 = arith.constant 0 : i32
    %c0_i32_1 = arith.constant 0 : i32
    return %c0_i32, %c0_i32_0 : i32, i32
  }
  func.func @transform_10(%arg0: i32, %arg1: i32) -> (i32, i32) {
    %c0_i32 = arith.constant 0 : i32
    %c0_i32_0 = arith.constant 0 : i32
    %c0_i32_1 = arith.constant 0 : i32
    return %c0_i32, %c0_i32_0 : i32, i32
  }
  func.func @transform_11(%arg0: i32, %arg1: i32) -> (i32, i32, i32) {
    %c0_i32 = arith.constant 0 : i32
    %c0_i32_0 = arith.constant 0 : i32
    return %arg0, %arg1, %c0_i32 : i32, i32, i32
  }
}

</mosaic_0001>

<bundles_post_ra>
// kernel: temporal_conv_net.1
= control target key start
LH: loop header
LB: loop body
LE: loop exit
PB: predicated region body
PF: predicated region fallthrough
CT: control target
= control target key end

     0   :  { %s1614_s17 = smov 0   ;;  %s1616_s18 = smov 0   ;;  %s2134_s0 = inlined_call_operand.vmem [shape: f32[2,16,128], index: 0, kind: input, shape index: {}]   ;;  %s2135_s1 = inlined_call_operand.vmem [shape: f32[256,128], index: 1, kind: input, shape index: {}]   ;;  %s2136_s2 = inlined_call_operand.vmem [shape: f32[1,128], index: 2, kind: input, shape index: {}]   ;;  %s2137_s3 = inlined_call_operand.vmem [shape: f32[256,128], index: 3, kind: input, shape index: {}]   ;;  %s2138_s4 = inlined_call_operand.vmem [shape: f32[1,128], index: 4, kind: input, shape index: {}]   ;;  %s2139_s5 = inlined_call_operand.vmem [shape: f32[128,128], index: 5, kind: input, shape index: {}]   ;;  %s2140_s6 = inlined_call_operand.vmem [shape: f32[1,128], index: 6, kind: input, shape index: {}]   ;;  %s2141_s7 = inlined_call_operand.vmem [shape: f32[256,128], index: 7, kind: input, shape index: {}]   ;;  %s2142_s8 = inlined_call_operand.vmem [shape: f32[1,128], index: 8, kind: input, shape index: {}]   ;;  %s2143_s9 = inlined_call_operand.vmem [shape: f32[256,128], index: 9, kind: input, shape index: {}]   ;;  %s2144_s10 = inlined_call_operand.vmem [shape: f32[1,128], index: 10, kind: input, shape index: {}]   ;;  %s2145_s11 = inlined_call_operand.vmem [shape: f32[2,16,128], index: 11, kind: output, shape index: {}]  }
   0x1   :  { %s1618_s19 = smov 0   ;;  %s1620_s20 = smov 0  }
   0x2   :  { %s1622_s21 = smov 0  }
   0x3 LB: > { %s30_s22 = sadd.s32 1, %s1540_s19  ;;  %s33_s23 = sadd.s32 1, %s1544_s20  ;;  %s1548_s21 = sphi %s1622_s21, %s21_s21   ;;  %s1544_s20 = sphi %s1620_s20, %s2149_s20   ;;  %s1540_s19 = sphi %s1618_s19, %s2148_s19   ;;  %s1536_s18 = sphi %s1616_s18, %s2147_s18   ;;  %s1532_s17 = sphi %s1614_s17, %s2146_s17  }
   0x4   : > { %p31_p0 = scmp.ge.s32.totalorder %s30_s22, 2  ;;  %p1105_p1 = scmp.ge.s32.totalorder %s1548_s21, 1 }
   0x5   : > { %p356_p2 = scmp.lt.s32.totalorder %s1548_s21, 5 }
   0x6   : > { %s2151_s22 = smov (%p31_p0, %s30_s22), 0  ;;  %s2153_s23 = smov (!%p31_p0, %s33_s23), %s1544_s20 }
   0x7   : > { %p357_p3 = pnand %p1105_p1, %p356_p2  ;;  %p35_p4 = scmp.ge.s32.totalorder %s2153_s23, 2 }
   0x8   : > { %p402_p5 = scmp.lt.s32.totalorder (!%p357_p3), %s1536_s18, 1  ;;  %p404_p6 = scmp.lt.s32.totalorder (!%p357_p3), %s1532_s17, 1 }
   0x9   : > { %s2155_s23 = smov (%p35_p4, %s2153_s23), 0  ;;  %360 = sbr.rel (%p357_p3) target bundleno = 952 (0x3b8), region = 64 }
   0xa   : > { %p1110_p7 = scmp.ne.s32.totalorder (!%p357_p3), %s1532_s17, 0 }
  0x10   : > { %s2157_s18 = smov (!%p402_p5, %s1536_s18), 1  ;;  %421 = sbr.rel (%p1110_p7) target bundleno = 23 (0x17), region = 68 }
  0x11   : > { %s405_s24 = scalar_select %p404_p6, %s1532_s17, 1 }
  0x12   : > { %s1106_s25 = sshll.u32 %s2157_s18, 1  ;;  %v1550_v0 = vmov (!%p1110_p7), 0.0  }
  0x13   : > { %s407_s26 = sadd.s32 %s1106_s25, %s405_s24  ;;  %422 = vst [vmem:[#allocation2] sm:$0xff] (!%p1110_p7), %v1550_v0  ;;  %423 = vst [vmem:[#allocation3] sm:$0xff] (!%p1110_p7), %v1550_v0 }
  0x14   : > { %s1107_s27 = sshll.u32 %s407_s26, 3  ;;  %424 = vst [vmem:[#allocation4] sm:$0xff] (!%p1110_p7), %v1550_v0  ;;  %425 = vst [vmem:[#allocation5] sm:$0xff] (!%p1110_p7), %v1550_v0 }
  0x15   : > { %s1647_s30 = scalar_lea.vmem %s2134_s0, %s1107_s27  ;;  %s1652_s14 = scalar_lea.vmem %s2145_s11, %s1107_s27 }
  0x17 PF: > { %v447_v1 = vld [vmem:[%s2135_s1 + $0x80] sm:$0xff]  ;;  %v448_v2 = vld [vmem:[%s2135_s1 + $0x88] sm:$0xff]  ;;  %v449_v6 = vld [vmem:[%s2135_s1 + $0x90] sm:$0xff]  ;;  %vm471_vm0 = vcmask 1040384   ;;  %vm1552_vm1 = vmmov 0   ;;  %vm811_vm2 = vcmask 1041408  }
  0x18   : > { %v431_v3 = vld [vmem:[%s2135_s1] sm:$0xff]  ;;  %v1314_v4 = vpack.c.bf16 %v448_v2, %v447_v1  ;;  %v432_v5 = vld [vmem:[%s2135_s1 + $0x8] sm:$0xff]  ;;  %v450_v7 = vld [vmem:[%s2135_s1 + $0x98] sm:$0xff] }
  0x19   : > { %v1316_v8 = vpack.c.bf16 %v432_v5, %v431_v3  ;;  %v1318_v9 = vpack.c.bf16 %v450_v7, %v449_v6  ;;  %v433_v10 = vld [vmem:[%s2135_s1 + $0x10] sm:$0xff]  ;;  %v434_v11 = vld [vmem:[%s2135_s1 + $0x18] sm:$0xff]  ;;  %v451_v12 = vld [vmem:[%s2135_s1 + $0xa0] sm:$0xff] }
  0x1a   : > { %1315 = vmatprep.subr.bf16.mxu0 %v1314_v4  ;;  %v452_v13 = vld [vmem:[%s2135_s1 + $0xa8] sm:$0xff]  ;;  %v1320_v14 = vpack.c.bf16 %v434_v11, %v433_v10  ;;  %v435_v16 = vld [vmem:[%s2135_s1 + $0x20] sm:$0xff]  ;;  %v453_v18 = vld [vmem:[%s2135_s1 + $0xb0] sm:$0xff] }
  0x1b   : > { %1317 = vmatpush3.bf16.msra.mxu0 %v1316_v8  ;;  %v1322_v15 = vpack.c.bf16 %v452_v13, %v451_v12  ;;  %v436_v17 = vld [vmem:[%s2135_s1 + $0x28] sm:$0xff]  ;;  %v454_v19 = vld [vmem:[%s2135_s1 + $0xb8] sm:$0xff]  ;;  %v437_v22 = vld [vmem:[%s2135_s1 + $0x30] sm:$0xff] }
  0x1c   : > { %1319 = vmatprep.subr.bf16.mxu0 %v1318_v9  ;;  %v1324_v20 = vpack.c.bf16 %v436_v17, %v435_v16  ;;  %v1326_v21 = vpack.c.bf16 %v454_v19, %v453_v18  ;;  %v438_v23 = vld [vmem:[%s2135_s1 + $0x38] sm:$0xff]  ;;  %v455_v24 = vld [vmem:[%s2135_s1 + $0xc0] sm:$0xff]  ;;  %v456_v25 = vld [vmem:[%s2135_s1 + $0xc8] sm:$0xff] }
  0x1d   : > { %v1709_v26 = vld [vmem:[%s1647_s30] sm:$0xff]  ;;  %v440_v28 = vld [vmem:[%s2135_s1 + $0x48] sm:$0xff]  ;;  %v1328_v32 = vpack.c.bf16 %v438_v23, %v437_v22  ;;  %v572_v36 = vld [vmem:[%s2137_s3 + $0x90] sm:$0xff]  ;;  %v1330_v37 = vpack.c.bf16 %v456_v25, %v455_v24 }
  0x1e   : > { %v439_v27 = vld [vmem:[%s2135_s1 + $0x40] sm:$0xff]  ;;  %543 = vmatprep.mubr.f32.mxu0 %v1709_v26  ;;  %v571_v31 = vld [vmem:[%s2137_s3 + $0x88] sm:$0xff]  ;;  %v573_v39 = vld [vmem:[%s2137_s3 + $0x98] sm:$0xff] }
  0x1f   : > { %1321 = vmatpush3.bf16.msra.mxu0 %v1320_v14  ;;  %v1718_v29 = vld [vmem:[#allocation2] sm:$0xff]  ;;  %v555_v35 = vld [vmem:[%s2137_s3 + $0x8] sm:$0xff]  ;;  %v556_v40 = vld [vmem:[%s2137_s3 + $0x10] sm:$0xff]  ;;  %v1350_v44 = vpack.c.bf16 %v573_v39, %v572_v36  ;;  %v1332_v48 = vpack.c.bf16 %v440_v28, %v439_v27  ;;  %v1551_v27 = vmov 0.0|0.0  }
  0x20   : > { %1323 = vmatprep.subr.bf16.mxu0 %v1322_v15  ;;  %v570_v30 = vld [vmem:[%s2137_s3 + $0x80] sm:$0xff]  ;;  %428 = vst [vmem:[#allocation2] sm:$0xff] %v1709_v26  ;;  %v557_v41 = vld [vmem:[%s2137_s3 + $0x18] sm:$0xff]  ;;  %v457_v42 = vld [vmem:[%s2135_s1 + $0xd0] sm:$0xff]  ;;  %v472_v19 = vrot.slane %v1718_v29, 7 }
  0x21   : > { %v1346_v33 = vpack.c.bf16 %v571_v31, %v570_v30  ;;  %v554_v34 = vld [vmem:[%s2137_s3] sm:$0xff]  ;;  %v458_v43 = vld [vmem:[%s2135_s1 + $0xd8] sm:$0xff]  ;;  %v1352_v46 = vpack.c.bf16 %v557_v41, %v556_v40  ;;  %v575_v47 = vld [vmem:[%s2137_s3 + $0xa8] sm:$0xff] }
  0x22   : > { %v1348_v38 = vpack.c.bf16 %v555_v35, %v554_v34  ;;  %v574_v45 = vld [vmem:[%s2137_s3 + $0xa0] sm:$0xff]  ;;  %v441_v49 = vld [vmem:[%s2135_s1 + $0x50] sm:$0xff]  ;;  %v559_v52 = vld [vmem:[%s2137_s3 + $0x28] sm:$0xff]  ;;  %v1334_v53 = vpack.c.bf16 %v458_v43, %v457_v42 }
  0x23   : > { %1325 = vmatpush3.bf16.msra.mxu0 %v1324_v20  ;;  %1347 = vmatprep.subr.bf16.mxu1 %v1346_v33  ;;  %v1354_v50 = vpack.c.bf16 %v575_v47, %v574_v45  ;;  %v558_v51 = vld [vmem:[%s2137_s3 + $0x20] sm:$0xff]  ;;  %v442_v54 = vld [vmem:[%s2135_s1 + $0x58] sm:$0xff]  ;;  %v576_v55 = vld [vmem:[%s2137_s3 + $0xb0] sm:$0xff]  ;;  %v473_v20 = vrot.slane %v1709_v26, 7 }
  0x24   : > { %1327 = vmatprep.subr.bf16.mxu0 %v1326_v21  ;;  %1349 = vmatpush3.bf16.msra.mxu1 %v1348_v38  ;;  %v577_v56 = vld [vmem:[%s2137_s3 + $0xb8] sm:$0xff]  ;;  %v459_v57 = vld [vmem:[%s2135_s1 + $0xe0] sm:$0xff]  ;;  %v460_v58 = vld [vmem:[%s2135_s1 + $0xe8] sm:$0xff]  ;;  %v1356_v59 = vpack.c.bf16 %v559_v52, %v558_v51  ;;  %v1336_v60 = vpack.c.bf16 %v442_v54, %v441_v49 }
  0x25   : > { %1351 = vmatprep.subr.bf16.mxu1 %v1350_v44  ;;  %v443_v61 = vld [vmem:[%s2135_s1 + $0x60] sm:$0xff]  ;;  %v1358_v62 = vpack.c.bf16 %v577_v56, %v576_v55  ;;  %v560_v63 = vld [vmem:[%s2137_s3 + $0x30] sm:$0xff]  ;;  %v561_v0 = vld [vmem:[%s2137_s3 + $0x38] sm:$0xff]  ;;  %v1338_v1 = vpack.c.bf16 %v460_v58, %v459_v57  ;;  %v474_v24 = vsel %vm471_vm0, %v472_v19, %v473_v20 }
  0x26   : > { %v444_v2 = vld [vmem:[%s2135_s1 + $0x68] sm:$0xff]  ;;  %v578_v3 = vld [vmem:[%s2137_s3 + $0xc0] sm:$0xff]  ;;  %v461_v5 = vld [vmem:[%s2135_s1 + $0xf0] sm:$0xff]  ;;  %v1360_v7 = vpack.c.bf16 %v561_v0, %v560_v63 }
  0x27   : > { %1329 = vmatpush3.bf16.msra.mxu0 %v1328_v32  ;;  %v579_v4 = vld [vmem:[%s2137_s3 + $0xc8] sm:$0xff]  ;;  %v462_v6 = vld [vmem:[%s2135_s1 + $0xf8] sm:$0xff]  ;;  %v1340_v8 = vpack.c.bf16 %v444_v2, %v443_v61  ;;  %v445_v9 = vld [vmem:[%s2135_s1 + $0x70] sm:$0xff]  ;;  %v1553_v2 = vmov 0.0  }
  0x28   : > { %1331 = vmatprep.subr.bf16.mxu0 %v1330_v37  ;;  %1353 = vmatpush3.bf16.msra.mxu1 %v1352_v46  ;;  %v1362_v10 = vpack.c.bf16 %v579_v4, %v578_v3  ;;  %v562_v11 = vld [vmem:[%s2137_s3 + $0x40] sm:$0xff]  ;;  %v563_v12 = vld [vmem:[%s2137_s3 + $0x48] sm:$0xff]  ;;  %v1342_v13 = vpack.c.bf16 %v462_v6, %v461_v5  ;;  %v446_v14 = vld [vmem:[%s2135_s1 + $0x78] sm:$0xff] }
  0x29   : > { %1355 = vmatprep.subr.bf16.mxu1 %v1354_v50  ;;  %v580_v15 = vld [vmem:[%s2137_s3 + $0xd0] sm:$0xff]  ;;  %v581_v16 = vld [vmem:[%s2137_s3 + $0xd8] sm:$0xff]  ;;  %v1364_v17 = vpack.c.bf16 %v563_v12, %v562_v11  ;;  %v1344_v18 = vpack.c.bf16 %v446_v14, %v445_v9  ;;  %v672_v22 = vld [vmem:[%s2139_s5] sm:$0xff] }
  0x2a   : > { %v1366_v21 = vpack.c.bf16 %v581_v16, %v580_v15  ;;  %v673_v23 = vld [vmem:[%s2139_s5 + $0x8] sm:$0xff]  ;;  %v674_v28 = vld [vmem:[%s2139_s5 + $0x10] sm:$0xff]  ;;  %v675_v29 = vld [vmem:[%s2139_s5 + $0x18] sm:$0xff] }
  0x2b   : > { %1333 = vmatpush3.bf16.msra.mxu0 %v1332_v48  ;;  %v1379_v25 = vpack.c.bf16 %v673_v23, %v672_v22  ;;  %v1382_v30 = vpack.c.bf16 %v675_v29, %v674_v28  ;;  %v676_v31 = vld [vmem:[%s2139_s5 + $0x20] sm:$0xff]  ;;  %v677_v32 = vld [vmem:[%s2139_s5 + $0x28] sm:$0xff]  ;;  %v678_v34 = vld [vmem:[%s2139_s5 + $0x30] sm:$0xff] }
  0x2c   : > { %1335 = vmatprep.subr.bf16.mxu0 %v1334_v53  ;;  %1357 = vmatpush3.bf16.msra.mxu1 %v1356_v59  ;;  %v1385_v33 = vpack.c.bf16 %v677_v32, %v676_v31  ;;  %v679_v35 = vld [vmem:[%s2139_s5 + $0x38] sm:$0xff]  ;;  %v564_v37 = vld [vmem:[%s2137_s3 + $0x50] sm:$0xff]  ;;  %v680_v39 = vld [vmem:[%s2139_s5 + $0x40] sm:$0xff] }
  0x2d   : > { %1359 = vmatprep.subr.bf16.mxu1 %v1358_v62  ;;  %v1388_v36 = vpack.c.bf16 %v679_v35, %v678_v34  ;;  %v565_v38 = vld [vmem:[%s2137_s3 + $0x58] sm:$0xff]  ;;  %v681_v41 = vld [vmem:[%s2139_s5 + $0x48] sm:$0xff]  ;;  %v582_v43 = vld [vmem:[%s2137_s3 + $0xe0] sm:$0xff] }
  0x2e   : > { %v1368_v40 = vpack.c.bf16 %v565_v38, %v564_v37  ;;  %v1391_v42 = vpack.c.bf16 %v681_v41, %v680_v39  ;;  %v583_v44 = vld [vmem:[%s2137_s3 + $0xe8] sm:$0xff]  ;;  %v566_v46 = vld [vmem:[%s2137_s3 + $0x60] sm:$0xff]  ;;  %v682_v48 = vld [vmem:[%s2139_s5 + $0x50] sm:$0xff] }
  0x2f   : > { %1337 = vmatpush3.bf16.msra.mxu0 %v1336_v60  ;;  %v1370_v45 = vpack.c.bf16 %v583_v44, %v582_v43  ;;  %v567_v47 = vld [vmem:[%s2137_s3 + $0x68] sm:$0xff]  ;;  %v683_v50 = vld [vmem:[%s2139_s5 + $0x58] sm:$0xff]  ;;  %v584_v52 = vld [vmem:[%s2137_s3 + $0xf0] sm:$0xff] }
  0x30   : > { %1339 = vmatprep.subr.bf16.mxu0 %v1338_v1  ;;  %1361 = vmatpush3.bf16.msra.mxu1 %v1360_v7  ;;  %v1372_v49 = vpack.c.bf16 %v567_v47, %v566_v46  ;;  %v1394_v51 = vpack.c.bf16 %v683_v50, %v682_v48  ;;  %v585_v53 = vld [vmem:[%s2137_s3 + $0xf8] sm:$0xff]  ;;  %v568_v55 = vld [vmem:[%s2137_s3 + $0x70] sm:$0xff]  ;;  %v684_v57 = vld [vmem:[%s2139_s5 + $0x60] sm:$0xff] }
  0x31   : > { %1363 = vmatprep.subr.bf16.mxu1 %v1362_v10  ;;  %v1374_v54 = vpack.c.bf16 %v585_v53, %v584_v52  ;;  %v569_v56 = vld [vmem:[%s2137_s3 + $0x78] sm:$0xff]  ;;  %v685_v59 = vld [vmem:[%s2139_s5 + $0x68] sm:$0xff]  ;;  %v686_v61 = vld [vmem:[%s2139_s5 + $0x70] sm:$0xff] }
  0x32   : > { %v1376_v58 = vpack.c.bf16 %v569_v56, %v568_v55  ;;  %v1397_v60 = vpack.c.bf16 %v685_v59, %v684_v57  ;;  %v687_v62 = vld [vmem:[%s2139_s5 + $0x78] sm:$0xff]  ;;  %v787_v0 = vld [vmem:[%s2141_s7 + $0x80] sm:$0xff]  ;;  %v788_v1 = vld [vmem:[%s2141_s7 + $0x88] sm:$0xff] }
  0x33   : > { %1341 = vmatpush3.bf16.msra.mxu0 %v1340_v8  ;;  %v1400_v63 = vpack.c.bf16 %v687_v62, %v686_v61  ;;  %v1402_v3 = vpack.c.bf16 %v788_v1, %v787_v0  ;;  %v1111_v5 = vld [vmem:[%s2136_s2] ss:$0 sm:$0xff]  ;;  %v550_v8 = vld [vmem:[#allocation3] sm:$0xff]  ;;  %v790_v14 = vld [vmem:[%s2141_s7 + $0x98] sm:$0xff] }
  0x34   : > { %1343 = vmatprep.subr.bf16.mxu0 %v1342_v13  ;;  %1365 = vmatpush3.bf16.msra.mxu1 %v1364_v17  ;;  %v771_v10 = vld [vmem:[%s2141_s7] sm:$0xff]  ;;  %v772_v11 = vld [vmem:[%s2141_s7 + $0x8] sm:$0xff]  ;;  %v594_v13 = vrot.slane %v550_v8, 7  ;;  %v774_v19 = vld [vmem:[%s2141_s7 + $0x18] sm:$0xff] }
  0x35   : > { %1367 = vmatprep.subr.bf16.mxu1 %v1366_v21  ;;  %v1404_v16 = vpack.c.bf16 %v772_v11, %v771_v10  ;;  %v791_v21 = vld [vmem:[%s2141_s7 + $0xa0] sm:$0xff]  ;;  %v792_v22 = vld [vmem:[%s2141_s7 + $0xa8] sm:$0xff]  ;;  %v793_v28 = vld [vmem:[%s2141_s7 + $0xb0] sm:$0xff] }
  0x36   : > { %v794_v29 = vld [vmem:[%s2141_s7 + $0xb8] sm:$0xff]  ;;  %v777_v32 = vld [vmem:[%s2141_s7 + $0x30] sm:$0xff]  ;;  %v795_v34 = vld [vmem:[%s2141_s7 + $0xc0] sm:$0xff] }
  0x37   : > { %1345 = vmatpush3.bf16.msra.mxu0 %v1344_v18  ;;  %v773_v18 = vld [vmem:[%s2141_s7 + $0x10] sm:$0xff]  ;;  %v1414_v31 = vpack.c.bf16 %v794_v29, %v793_v28  ;;  %v796_v35 = vld [vmem:[%s2141_s7 + $0xc8] sm:$0xff]  ;;  %v779_v38 = vld [vmem:[%s2141_s7 + $0x40] sm:$0xff] }
  0x38   : > { %1378 = vmatprep.subr.bf16.mxu0 %v1551_v27  ;;  %1369 = vmatpush3.bf16.msra.mxu1 %v1368_v40  ;;  %v1408_v23 = vpack.c.bf16 %v774_v19, %v773_v18  ;;  %v1418_v37 = vpack.c.bf16 %v796_v35, %v795_v34  ;;  %v780_v39 = vld [vmem:[%s2141_s7 + $0x48] sm:$0xff]  ;;  %v797_v41 = vld [vmem:[%s2141_s7 + $0xd0] sm:$0xff]  ;;  %v799_v47 = vld [vmem:[%s2141_s7 + $0xe0] sm:$0xff] }
  0x39   : > { %1371 = vmatprep.subr.bf16.mxu1 %v1370_v45  ;;  %v1420_v40 = vpack.c.bf16 %v780_v39, %v779_v38  ;;  %v781_v44 = vld [vmem:[%s2141_s7 + $0x50] sm:$0xff]  ;;  %v782_v45 = vld [vmem:[%s2141_s7 + $0x58] sm:$0xff]  ;;  %v800_v48 = vld [vmem:[%s2141_s7 + $0xe8] sm:$0xff] }
  0x3a   : > { %544 = vmatmul.mubr.f32.vlgmr.msra.gmra.mrb[0].mxu0 %v474_v24  ;;  %v1410_v24 = vpack.c.bf16 %v792_v22, %v791_v21  ;;  %v1424_v46 = vpack.c.bf16 %v782_v45, %v781_v44  ;;  %v1426_v50 = vpack.c.bf16 %v800_v48, %v799_v47  ;;  %v784_v52 = vld [vmem:[%s2141_s7 + $0x68] sm:$0xff]  ;;  %v801_v55 = vld [vmem:[%s2141_s7 + $0xf0] sm:$0xff]  ;;  %v802_v56 = vld [vmem:[%s2141_s7 + $0xf8] sm:$0xff] }
  0x3b   : > { %1380 = vmatpush3.bf16.msra.mxu0 %v1379_v25  ;;  %1311 = vmatprep.mubr.msk.f32.mxu0 %vm1552_vm1, %v1553_v2  ;;  %v775_v25 = vld [vmem:[%s2141_s7 + $0x20] sm:$0xff]  ;;  %v1430_v57 = vpack.c.bf16 %v802_v56, %v801_v55  ;;  %v786_v59 = vld [vmem:[%s2141_s7 + $0x78] sm:$0xff]  ;;  %v911_v62 = vld [vmem:[%s2143_s9 + $0x88] sm:$0xff] }
  0x3c   : > { %1381 = vmatprep.subr.bf16.mxu0 %v1551_v27  ;;  %1373 = vmatpush3.bf16.msra.mxu1 %v1372_v49  ;;  %v910_v61 = vld [vmem:[%s2143_s9 + $0x80] sm:$0xff]  ;;  %v895_v1 = vld [vmem:[%s2143_s9 + $0x8] sm:$0xff]  ;;  %v912_v2 = vld [vmem:[%s2143_s9 + $0x90] sm:$0xff] }
  0x3d   : > { %1375 = vmatprep.subr.bf16.mxu1 %v1374_v54  ;;  %v1434_v0 = vpack.c.bf16 %v911_v62, %v910_v61  ;;  %v914_v8 = vld [vmem:[%s2143_s9 + $0xa0] sm:$0xff]  ;;  %v901_v18 = vld [vmem:[%s2143_s9 + $0x38] sm:$0xff]  ;;  %v767_v38 = vld [vmem:[#allocation4] sm:$0xff] }
  0x3e   : > { %v918_v19 = vld [vmem:[%s2143_s9 + $0xc0] sm:$0xff]  ;;  %v904_v44 = vld [vmem:[%s2143_s9 + $0x50] sm:$0xff]  ;;  %v905_v45 = vld [vmem:[%s2143_s9 + $0x58] sm:$0xff] }
  0x3f   : > { %1383 = vmatpush3.bf16.msra.mxu0 %v1382_v30  ;;  %v922_v47 = vld [vmem:[%s2143_s9 + $0xe0] sm:$0xff]  ;;  %v923_v48 = vld [vmem:[%s2143_s9 + $0xe8] sm:$0xff]  ;;  %v908_v56 = vld [vmem:[%s2143_s9 + $0x70] sm:$0xff] }
  0x40   : > { %1384 = vmatprep.subr.bf16.mxu0 %v1551_v27  ;;  %1377 = vmatpush3.bf16.msra.mxu1 %v1376_v58  ;;  %v785_v58 = vld [vmem:[%s2141_s7 + $0x70] sm:$0xff] }
  0x41   : > { %1403 = vmatprep.subr.bf16.mxu1 %v1402_v3  ;;  %v913_v3 = vld [vmem:[%s2143_s9 + $0x98] sm:$0xff] }
  0x43   : > { %1386 = vmatpush3.bf16.msra.mxu0 %v1385_v33  ;;  %v778_v33 = vld [vmem:[%s2141_s7 + $0x38] sm:$0xff] }
  0x44   : > { %1387 = vmatprep.subr.bf16.mxu0 %v1551_v27 }
  0x47   : > { %1389 = vmatpush3.bf16.msra.mxu0 %v1388_v36  ;;  %v1416_v36 = vpack.c.bf16 %v778_v33, %v777_v32  ;;  %v1115_v33 = vld [vmem:[%s2140_s6] ss:$0 sm:$0xff] }
  0x48   : > { %1390 = vmatprep.subr.bf16.mxu0 %v1551_v27 }
  0x4b   : > { %1392 = vmatpush3.bf16.msra.mxu0 %v1391_v42  ;;  %v798_v42 = vld [vmem:[%s2141_s7 + $0xd8] sm:$0xff] }
  0x4c   : > { %1393 = vmatprep.subr.bf16.mxu0 %v1551_v27  ;;  %v1422_v43 = vpack.c.bf16 %v798_v42, %v797_v41  ;;  %v812_v41 = vrot.slane %v767_v38, 6 }
  0x4f   : > { %1395 = vmatpush3.bf16.msra.mxu0 %v1394_v51  ;;  %v783_v51 = vld [vmem:[%s2141_s7 + $0x60] sm:$0xff] }
  0x50   : > { %1396 = vmatprep.subr.bf16.mxu0 %v1551_v27  ;;  %v1428_v54 = vpack.c.bf16 %v784_v52, %v783_v51  ;;  %v907_v51 = vld [vmem:[%s2143_s9 + $0x68] sm:$0xff] }
  0x53   : > { %1398 = vmatpush3.bf16.msra.mxu0 %v1397_v60  ;;  %v1432_v60 = vpack.c.bf16 %v786_v59, %v785_v58 }
  0x54   : > { %1399 = vmatprep.subr.bf16.mxu0 %v1551_v27  ;;  %v776_v27 = vld [vmem:[%s2141_s7 + $0x28] sm:$0xff] }
  0x55   : > { %v1412_v30 = vpack.c.bf16 %v776_v27, %v775_v25  ;;  %v920_v25 = vld [vmem:[%s2143_s9 + $0xd0] sm:$0xff]  ;;  %v921_v27 = vld [vmem:[%s2143_s9 + $0xd8] sm:$0xff] }
  0x56   : > { %v1454_v29 = vpack.c.bf16 %v921_v27, %v920_v25 }
  0x57   : > { %1401 = vmatpush3.bf16.msra.mxu0 %v1400_v63  ;;  %v894_v63 = vld [vmem:[%s2143_s9] sm:$0xff] }
  0x58   : > { %1435 = vmatprep.subr.bf16.mxu0 %v1434_v0 }
  0x5a   : > { %1312 = vmatmul.mubr.f32.vlgmr.msra.gmra.mrb[2].mxu0 %v1709_v26  ;;  %v789_v26 = vld [vmem:[%s2141_s7 + $0x90] sm:$0xff] }
  0x5b   : > { %v1406_v17 = vpack.c.bf16 %v790_v14, %v789_v26  ;;  %v916_v26 = vld [vmem:[%s2143_s9 + $0xb0] sm:$0xff]  ;;  %v917_v14 = vld [vmem:[%s2143_s9 + $0xb8] sm:$0xff] }
 0x10d   : > { %v1154_v4 = vpop.f32.mrb[0].mxu0 }
 0x10e   : > { %v1155_v6 = vpop.f32.mrb[1].mxu0 }
 0x10f   : > { %v1156_v7 = vadd.f32 %v1155_v6, %v1154_v4  ;;  %v1436_v4 = vpack.c.bf16 %v895_v1, %v894_v63  ;;  %v896_v6 = vld [vmem:[%s2143_s9 + $0x10] sm:$0xff]  ;;  %v890_v63 = vld [vmem:[#allocation5] sm:$0xff] }
 0x111   : > { %v546_v9 = vadd.f32 %v1156_v7, %v1111_v5  ;;  %v1438_v5 = vpack.c.bf16 %v913_v3, %v912_v2  ;;  %v897_v7 = vld [vmem:[%s2143_s9 + $0x18] sm:$0xff]  ;;  %1437 = vmatpush3.bf16.msra.mxu0 %v1436_v4  ;;  %v934_v2 = vrot.slane %v890_v63, 6 }
 0x112   : > { %v1440_v10 = vpack.c.bf16 %v897_v7, %v896_v6  ;;  %v1118_v6 = vld [vmem:[%s2144_s10] ss:$0 sm:$0xff] }
 0x113   : > { %v549_v12 = vmax.f32 %v546_v9, 0.0  ;;  %v915_v9 = vld [vmem:[%s2143_s9 + $0xa8] sm:$0xff]  ;;  %1439 = vmatprep.subr.bf16.mxu0 %v1438_v5 }
 0x114   : > { %v1442_v11 = vpack.c.bf16 %v915_v9, %v914_v8 }
 0x115   : > { %665 = vmatprep.mubr.f32.mxu1 %v549_v12  ;;  %551 = vst [vmem:[#allocation3] sm:$0xff] %v549_v12  ;;  %v595_v15 = vrot.slane %v549_v12, 7  ;;  %v898_v12 = vld [vmem:[%s2143_s9 + $0x20] sm:$0xff]  ;;  %1441 = vmatpush3.bf16.msra.mxu0 %v1440_v10 }
 0x116   : > { %1443 = vmatprep.subr.bf16.mxu0 %v1442_v11 }
 0x117   : > { %v596_v20 = vsel %vm471_vm0, %v594_v13, %v595_v15  ;;  %v899_v13 = vld [vmem:[%s2143_s9 + $0x28] sm:$0xff] }
 0x118   : > { %666 = vmatmul.mubr.f32.vlgmr.msra.gmra.mrb[0].mxu1 %v596_v20  ;;  %v1444_v15 = vpack.c.bf16 %v899_v13, %v898_v12  ;;  %v919_v20 = vld [vmem:[%s2143_s9 + $0xc8] sm:$0xff] }
 0x119   : > { %1405 = vmatpush3.bf16.msra.mxu1 %v1404_v16  ;;  %v1446_v16 = vpack.c.bf16 %v917_v14, %v916_v26  ;;  %v1450_v22 = vpack.c.bf16 %v919_v20, %v918_v19 }
 0x11a   : > { %1407 = vmatprep.subr.bf16.mxu1 %v1406_v17  ;;  %v900_v17 = vld [vmem:[%s2143_s9 + $0x30] sm:$0xff]  ;;  %1445 = vmatpush3.bf16.msra.mxu0 %v1444_v15 }
 0x11b   : > { %v1448_v21 = vpack.c.bf16 %v901_v18, %v900_v17  ;;  %1447 = vmatprep.subr.bf16.mxu0 %v1446_v16 }
 0x11d   : > { %1409 = vmatpush3.bf16.msra.mxu1 %v1408_v23  ;;  %v902_v23 = vld [vmem:[%s2143_s9 + $0x40] sm:$0xff] }
 0x11e   : > { %1411 = vmatprep.subr.bf16.mxu1 %v1410_v24  ;;  %v903_v24 = vld [vmem:[%s2143_s9 + $0x48] sm:$0xff]  ;;  %1449 = vmatpush3.bf16.msra.mxu0 %v1448_v21 }
 0x11f   : > { %v1452_v28 = vpack.c.bf16 %v903_v24, %v902_v23  ;;  %1451 = vmatprep.subr.bf16.mxu0 %v1450_v22 }
 0x121   : > { %1413 = vmatpush3.bf16.msra.mxu1 %v1412_v30 }
 0x122   : > { %1415 = vmatprep.subr.bf16.mxu1 %v1414_v31  ;;  %1453 = vmatpush3.bf16.msra.mxu0 %v1452_v28  ;;  %v1113_v31 = vld [vmem:[%s2138_s4] ss:$0 sm:$0xff] }
 0x123   : > { %1455 = vmatprep.subr.bf16.mxu0 %v1454_v29 }
 0x125   : > { %1417 = vmatpush3.bf16.msra.mxu1 %v1416_v36 }
 0x126   : > { %1419 = vmatprep.subr.bf16.mxu1 %v1418_v37 }
 0x129   : > { %1421 = vmatpush3.bf16.msra.mxu1 %v1420_v40 }
 0x12a   : > { %1423 = vmatprep.subr.bf16.mxu1 %v1422_v43 }
 0x12d   : > { %1425 = vmatpush3.bf16.msra.mxu1 %v1424_v46  ;;  %v1987_v49 = vpop.f32.mrb[2].mxu0  ;;  %v1456_v46 = vpack.c.bf16 %v905_v45, %v904_v44 }
 0x12e   : > { %v1313_v53 = vpop.f32.mrb[3].mxu0  ;;  %1427 = vmatprep.subr.bf16.mxu1 %v1426_v50  ;;  %v762_v36 = vadd.f32 %v1115_v33, %v1987_v49  ;;  %v1458_v49 = vpack.c.bf16 %v923_v48, %v922_v47  ;;  %v906_v50 = vld [vmem:[%s2143_s9 + $0x60] sm:$0xff] }
 0x12f   : > { %1457 = vmatpush3.bf16.msra.mxu0 %v1456_v46  ;;  %v1460_v52 = vpack.c.bf16 %v907_v51, %v906_v50  ;;  %v924_v53 = vld [vmem:[%s2143_s9 + $0xf0] sm:$0xff] }
 0x130   : > { %1459 = vmatprep.subr.bf16.mxu0 %v1458_v49 }
 0x131   : > { %1429 = vmatpush3.bf16.msra.mxu1 %v1428_v54  ;;  %v925_v54 = vld [vmem:[%s2143_s9 + $0xf8] sm:$0xff] }
 0x132   : > { %1431 = vmatprep.subr.bf16.mxu1 %v1430_v57  ;;  %v1462_v55 = vpack.c.bf16 %v925_v54, %v924_v53  ;;  %v909_v57 = vld [vmem:[%s2143_s9 + $0x78] sm:$0xff] }
 0x133   : > { %1461 = vmatpush3.bf16.msra.mxu0 %v1460_v52  ;;  %v1464_v58 = vpack.c.bf16 %v909_v57, %v908_v56 }
 0x134   : > { %1463 = vmatprep.subr.bf16.mxu0 %v1462_v55 }
 0x135   : > { %1433 = vmatpush3.bf16.msra.mxu1 %v1432_v60  ;;  %v1116_v60 = vld [vmem:[%s2142_s8] ss:$0 sm:$0xff] }
 0x137   : > { %1465 = vmatpush3.bf16.msra.mxu0 %v1464_v58 }
 0x1eb   : > { %v1189_v30 = vpop.f32.mrb[0].mxu1 }
 0x1ec   : > { %v1190_v32 = vpop.f32.mrb[1].mxu1 }
 0x1ed   : > { %v1191_v34 = vadd.f32 %v1190_v32, %v1189_v30 }
 0x1ef   : > { %v668_v35 = vadd.f32 %v1191_v34, %v1113_v31 }
 0x1f1   : > { %v671_v37 = vmax.f32 %v668_v35, 0.0 }
 0x1f3   : > { %v765_v39 = vadd.f32 %v762_v36, %v671_v37 }
 0x1f5   : > { %v766_v40 = vmax.f32 %v765_v39, 0.0 }
 0x1f7   : > { %883 = vmatprep.mubr.f32.mxu1 %v766_v40  ;;  %768 = vst [vmem:[#allocation4] sm:$0xff] %v766_v40  ;;  %v813_v42 = vrot.slane %v766_v40, 6 }
 0x1f9   : > { %v814_v43 = vsel %vm811_vm2, %v812_v41, %v813_v42 }
 0x1fa   : > { %884 = vmatmul.mubr.f32.vlgmr.msra.gmra.mrb[2].mxu1 %v814_v43 }
 0x2cd   : > { %v1241_v59 = vpop.f32.mrb[2].mxu1 }
 0x2ce   : > { %v1242_v61 = vpop.f32.mrb[3].mxu1 }
 0x2cf   : > { %v1243_v62 = vadd.f32 %v1242_v61, %v1241_v59 }
 0x2d1   : > { %v886_v0 = vadd.f32 %v1243_v62, %v1116_v60 }
 0x2d3   : > { %v889_v1 = vmax.f32 %v886_v0, 0.0 }
 0x2d5   : > { %891 = vst [vmem:[#allocation5] sm:$0xff] %v889_v1  ;;  %v935_v3 = vrot.slane %v889_v1, 6  ;;  %1005 = vmatprep.mubr.f32.mxu0 %v889_v1 }
 0x2d7   : > { %v936_v4 = vsel %vm811_vm2, %v934_v2, %v935_v3 }
 0x2d8   : > { %1006 = vmatmul.mubr.f32.vlgmr.msra.gmra.mrb[4].mxu0 %v936_v4 }
 0x3ab   : > { %v1276_v5 = vpop.f32.mrb[4].mxu0 }
 0x3ac   : > { %v1277_v7 = vpop.f32.mrb[5].mxu0 }
 0x3ad   : > { %v1278_v8 = vadd.f32 %v1277_v7, %v1276_v5 }
 0x3af   : > { %v1008_v9 = vadd.f32 %v1278_v8, %v1118_v6 }
 0x3b1   : > { %v1011_v10 = vmax.f32 %v1008_v9, 0.0 }
 0x3b3   : > { %v1012_v11 = vadd.f32 %v1011_v10, %v766_v40 }
 0x3b5   : > { %v1013_v12 = vmax.f32 %v1012_v11, 0.0 }
 0x3b7   : > { %1014 = vst [vmem:[%s1652_s14] sm:$0xff] %v1013_v12 }
 0x3b8 PF: > { %s21_s21 = sadd.s32 1, %s1548_s21   ;;  %s2146_s17 = smov %s1540_s19 }
 0x3b9   : > { %p18_p8 = scmp.ge.s32.totalorder %s21_s21, 6   ;;  %s2147_s18 = smov %s1544_s20 }
 0x3ba   : > { %s2148_s19 = smov %s2151_s22  ;;  %s2149_s20 = smov %s2155_s23 }
 0x3bb   :  { %20 = sbr.rel (!%p18_p8) target bundleno = 3 (0x3), region = 98 }

</bundles_post_ra>
